<compile_context>
chip_gen: v6e
topology: v6e:2x2x1
jax: 0.10.0
libtpu: 0.0.40
codegen_flags: <defaults>
</compile_context>

<pallas_src>
import functools

import jax
import jax.numpy as jnp
from jax.experimental import pallas as pl
from jax.experimental.pallas import tpu as pltpu


def _round_up(x, m):
    return (x + m - 1) // m * m


# ----------------------------------------------------------------------------
# Fused matmul kernel: (M,K)@(K,N) + per-channel affine (+ residual) (+ ReLU)
# ----------------------------------------------------------------------------
def _mm_fused_kernel(*refs, relu, has_res):
    if has_res:
        a_ref, b_ref, scale_ref, shift_ref, res_ref, o_ref = refs
    else:
        a_ref, b_ref, scale_ref, shift_ref, o_ref = refs
        res_ref = None

    k = pl.program_id(2)

    @pl.when(k == 0)
    def _():
        o_ref[...] = jnp.zeros_like(o_ref)

    # bf16 x bf16 -> f32 accumulate directly into the VMEM-resident output tile.
    o_ref[...] += jnp.dot(a_ref[...], b_ref[...],
                          preferred_element_type=jnp.float32)

    @pl.when(k == pl.num_programs(2) - 1)
    def _():
        y = o_ref[...] * scale_ref[...] + shift_ref[...]
        if has_res:
            y = y + res_ref[...]
        if relu:
            y = jnp.maximum(y, 0.0)
        o_ref[...] = y


def fused_matmul(a, w_p, scale_p, shift_p, *, n_out, residual=None, relu=False):
    """a: (M, K) float; w_p: pre-padded bf16 (Kp, Np); scale/shift: f32 (1, Np).

    Returns (M, n_out) f32 of  relu((a @ w) * scale + shift [+ residual]).
    """
    M, K = a.shape
    Kp, Np = w_p.shape
    assert K <= Kp and Np % 128 == 0

    tm = min(256, _round_up(M, 8))
    Mp = _round_up(M, tm)
    tn = 256 if Np % 256 == 0 else 128
    for bk in (512, 256, 128):
        if Kp % bk == 0:
            break

    a_p = jnp.pad(a.astype(jnp.bfloat16), ((0, Mp - M), (0, Kp - K)))

    has_res = residual is not None
    inputs = [a_p, w_p, scale_p, shift_p]
    in_specs = [
        pl.BlockSpec((tm, bk), lambda i, j, k: (i, k)),
        pl.BlockSpec((bk, tn), lambda i, j, k: (k, j)),
        pl.BlockSpec((1, tn), lambda i, j, k: (0, j)),
        pl.BlockSpec((1, tn), lambda i, j, k: (0, j)),
    ]
    if has_res:
        res_p = jnp.pad(residual.astype(jnp.float32),
                        ((0, Mp - M), (0, Np - residual.shape[1])))
        inputs.append(res_p)
        in_specs.append(pl.BlockSpec((tm, tn), lambda i, j, k: (i, j)))

    kernel = functools.partial(_mm_fused_kernel, relu=relu, has_res=has_res)
    out = pl.pallas_call(
        kernel,
        out_shape=jax.ShapeDtypeStruct((Mp, Np), jnp.float32),
        grid=(Mp // tm, Np // tn, Kp // bk),
        in_specs=in_specs,
        out_specs=pl.BlockSpec((tm, tn), lambda i, j, k: (i, j)),
        compiler_params=pltpu.CompilerParams(
            dimension_semantics=("parallel", "parallel", "arbitrary")),
    )(*inputs)
    return out[:M, :n_out]


# ----------------------------------------------------------------------------
# Pooling kernels
# ----------------------------------------------------------------------------
def _max_reduce_kernel(x_ref, o_ref):
    o_ref[...] = jnp.max(x_ref[...], axis=0)


def pallas_max_reduce(x):
    """x: (k*k, M, C) -> max over taps -> (M, C); tiled over M."""
    KK, M, C = x.shape
    tm = min(256, _round_up(M, 8))
    Mp = _round_up(M, tm)
    x_p = jnp.pad(x.astype(jnp.float32), ((0, 0), (0, Mp - M), (0, 0)))
    out = pl.pallas_call(
        _max_reduce_kernel,
        out_shape=jax.ShapeDtypeStruct((Mp, C), jnp.float32),
        grid=(Mp // tm,),
        in_specs=[pl.BlockSpec((KK, tm, C), lambda i: (0, i, 0))],
        out_specs=pl.BlockSpec((tm, C), lambda i: (i, 0)),
        compiler_params=pltpu.CompilerParams(dimension_semantics=("parallel",)),
    )(x_p)
    return out[:M]


def _mean_kernel(x_ref, o_ref):
    o_ref[...] = jnp.mean(x_ref[...], axis=1)


def pallas_global_avgpool(x):
    """x: (N, H*W, C) -> mean over spatial -> (N, C). Small; single block."""
    N, HW, C = x.shape
    return pl.pallas_call(
        _mean_kernel,
        out_shape=jax.ShapeDtypeStruct((N, C), jnp.float32),
        grid=(1,),
        in_specs=[pl.BlockSpec((N, HW, C), lambda i: (0, 0, 0))],
        out_specs=pl.BlockSpec((N, C), lambda i: (0, 0)),
    )(x.astype(jnp.float32))


# ----------------------------------------------------------------------------
# Glue: im2col (bf16), conv+bn, pooling, basic block
# ----------------------------------------------------------------------------
def _im2col(x, k, stride, pad):
    """x: (N, H, W, C) -> (N, Ho, Wo, k*k*C), (kh, kw, C) ordering. bf16 in -> bf16 out."""
    N, H, W, C = x.shape
    xp = jnp.pad(x, ((0, 0), (pad, pad), (pad, pad), (0, 0)))
    Ho = (H + 2 * pad - k) // stride + 1
    Wo = (W + 2 * pad - k) // stride + 1
    cols = []
    for i in range(k):
        for j in range(k):
            cols.append(xp[:, i:i + stride * Ho:stride, j:j + stride * Wo:stride, :])
    return jnp.concatenate(cols, axis=-1), Ho, Wo


def conv_bn(x, conv, k, stride, pad, relu=True, residual=None):
    """Conv2d(no bias) + BatchNorm(eval) [+ residual] [+ ReLU], fused in one kernel."""
    patches, Ho, Wo = _im2col(x.astype(jnp.bfloat16), k, stride, pad)
    N = x.shape[0]
    M = N * Ho * Wo
    a = patches.reshape(M, -1)
    res = None if residual is None else residual.reshape(M, -1)
    y = fused_matmul(a, conv["w"], conv["scale"], conv["shift"],
                     n_out=conv["cout"], residual=res, relu=relu)
    return y.reshape(N, Ho, Wo, conv["cout"])


def maxpool(x, k=3, stride=2, pad=1):
    N, H, W, C = x.shape
    xp = jnp.pad(x, ((0, 0), (pad, pad), (pad, pad), (0, 0)),
                 constant_values=-jnp.inf)
    Ho = (H + 2 * pad - k) // stride + 1
    Wo = (W + 2 * pad - k) // stride + 1
    M = N * Ho * Wo
    taps = [xp[:, i:i + stride * Ho:stride, j:j + stride * Wo:stride, :].reshape(1, M, C)
            for i in range(k) for j in range(k)]
    stacked = jnp.concatenate(taps, axis=0)          # (k*k, M, C), no big transpose
    y = pallas_max_reduce(stacked)
    return y.reshape(N, Ho, Wo, C)


def basic_block(x, blk):
    stride = blk["stride"]
    identity = x
    out = conv_bn(x, blk["conv1"], k=3, stride=stride, pad=1, relu=True)
    if "ds" in blk:
        identity = conv_bn(x, blk["ds"], k=1, stride=stride, pad=0, relu=False)
    out = conv_bn(out, blk["conv2"], k=3, stride=1, pad=1, relu=True,
                  residual=identity)
    return out


# ----------------------------------------------------------------------------
# Parameter init (synthetic, deterministic) + one-time fold / pad / bf16-cast
# ----------------------------------------------------------------------------
class _KeyGen:
    def __init__(self, key):
        self.key = key

    def next(self):
        self.key, sub = jax.random.split(self.key)
        return sub


def _init_conv_raw(kg, k, cin, cout):
    w = jax.random.normal(kg.next(), (k, k, cin, cout), jnp.float32)
    w = w * (1.0 / jnp.sqrt(float(k * k * cin)))
    return w.reshape(k * k * cin, cout)


def _init_bn_raw(kg, c):
    gamma = 1.0 + 0.1 * jax.random.normal(kg.next(), (c,), jnp.float32)
    beta = 0.1 * jax.random.normal(kg.next(), (c,), jnp.float32)
    mean = 0.1 * jax.random.normal(kg.next(), (c,), jnp.float32)
    var = 1.0 + 0.1 * jax.random.uniform(kg.next(), (c,), jnp.float32)
    return gamma, beta, mean, var


def _prep_conv(w_flat, bn, eps=1e-5):
    """Fold BN into per-channel affine, pad K/N to 128-multiples, cast weight to bf16."""
    K, N = w_flat.shape
    Kp, Np = _round_up(K, 128), _round_up(N, 128)
    gamma, beta, mean, var = bn
    scale = gamma / jnp.sqrt(var + eps)
    shift = beta - mean * scale
    return {
        "w": jnp.pad(w_flat, ((0, Kp - K), (0, Np - N))).astype(jnp.bfloat16),
        "scale": jnp.pad(scale, (0, Np - N)).reshape(1, Np).astype(jnp.float32),
        "shift": jnp.pad(shift, (0, Np - N)).reshape(1, Np).astype(jnp.float32),
        "cout": N,
    }


def _prep_fc(w, b):
    K, N = w.shape
    Kp, Np = _round_up(K, 128), _round_up(N, 128)
    return {
        "w": jnp.pad(w, ((0, Kp - K), (0, Np - N))).astype(jnp.bfloat16),
        "scale": jnp.pad(jnp.ones((N,), jnp.float32), (0, Np - N)).reshape(1, Np),
        "shift": jnp.pad(b.astype(jnp.float32), (0, Np - N)).reshape(1, Np),
        "cout": N,
    }


def init_resnet18_params(key):
    kg = _KeyGen(key)
    p = {"stem": _prep_conv(_init_conv_raw(kg, 7, 3, 64), _init_bn_raw(kg, 64))}
    stage_channels = [64, 128, 256, 512]
    in_c = 64
    layers = []
    for li, c in enumerate(stage_channels):
        blocks = []
        for bi in range(2):
            stride = 2 if (li > 0 and bi == 0) else 1
            blk = {
                "stride": stride,
                "conv1": _prep_conv(_init_conv_raw(kg, 3, in_c, c), _init_bn_raw(kg, c)),
                "conv2": _prep_conv(_init_conv_raw(kg, 3, c, c), _init_bn_raw(kg, c)),
            }
            if stride != 1 or in_c != c:
                blk["ds"] = _prep_conv(_init_conv_raw(kg, 1, in_c, c), _init_bn_raw(kg, c))
            blocks.append(blk)
            in_c = c
        layers.append(blocks)
    p["layers"] = layers
    p["fc"] = _prep_fc(
        jax.random.normal(kg.next(), (512, 10), jnp.float32) / jnp.sqrt(512.0),
        0.1 * jax.random.normal(kg.next(), (10,), jnp.float32))
    return p


# ----------------------------------------------------------------------------
# Full forward pass (== Model.forward)
# ----------------------------------------------------------------------------
def model_forward(params, x_nchw):
    x = jnp.transpose(x_nchw, (0, 2, 3, 1)).astype(jnp.float32)   # NCHW -> NHWC
    # stem
    x = conv_bn(x, params["stem"], k=7, stride=2, pad=3, relu=True)
    x = maxpool(x, k=3, stride=2, pad=1)
    # residual stages
    for blocks in params["layers"]:
        for blk in blocks:
            x = basic_block(x, blk)
    # global average pool + fc (bias folded into the matmul epilogue)
    N, H, W, C = x.shape
    feat = pallas_global_avgpool(x.reshape(N, H * W, C))           # (N, 512)
    fc = params["fc"]
    logits = fused_matmul(feat, fc["w"], fc["scale"], fc["shift"],
                          n_out=fc["cout"], relu=False)            # (N, 10)
    return logits


if __name__ == "__main__":
    key = jax.random.PRNGKey(0)
    k_x, k_p = jax.random.split(key)
    # small but structurally valid input: 32x32 RGB -> 1x1x512 before avgpool
    x = jax.random.normal(k_x, (2, 3, 32, 32), jnp.float32)        # NCHW like PyTorch
    params = init_resnet18_params(k_p)

    logits = model_forward(params, x)
    logits = jax.block_until_ready(logits)

    assert logits.shape == (2, 10), logits.shape
    assert bool(jnp.all(jnp.isfinite(logits)))
    print("KERNEL_OK")
</pallas_src>

<mosaic_0001>
module attributes {stable_mosaic.version = 11 : i64} {
  func.func @_mm_fused_kernel(%arg0: i32, %arg1: i32, %arg2: i32, %arg3: memref<256x256xbf16, #tpu.memory_space<vmem>>, %arg4: memref<256x128xbf16, #tpu.memory_space<vmem>>, %arg5: memref<1x128xf32, #tpu.memory_space<vmem>>, %arg6: memref<1x128xf32, #tpu.memory_space<vmem>>, %arg7: memref<256x128xf32, #tpu.memory_space<vmem>>) attributes {dimension_semantics = [#tpu.dimension_semantics<parallel>, #tpu.dimension_semantics<parallel>, #tpu.dimension_semantics<arbitrary>], iteration_bounds = array<i64: 2, 1, 1>, scalar_prefetch = 0 : i64, scratch_operands = 0 : i64, tpu.core_type = #tpu.core_type<tc>, window_params = [{transform_indices = @transform_0, window_bounds = array<i64: 256, 256>}, {transform_indices = @transform_1, window_bounds = array<i64: 256, 128>}, {transform_indices = @transform_2, window_bounds = array<i64: 1, 128>}, {transform_indices = @transform_3, window_bounds = array<i64: 1, 128>}, {transform_indices = @transform_4, window_bounds = array<i64: 256, 128>}]} {
    %c0_i32 = arith.constant 0 : i32
    %0 = arith.cmpi eq, %arg2, %c0_i32 : i32
    %1 = arith.extui %0 : i1 to i32
    %c0_i32_0 = arith.constant 0 : i32
    %2 = arith.cmpi ne, %1, %c0_i32_0 : i32
    scf.if %2 {
      %cst_10 = arith.constant 0.000000e+00 : f32
      %12 = vector.broadcast %cst_10 : f32 to vector<256x128xf32>
      %c0_11 = arith.constant 0 : index
      %c0_12 = arith.constant 0 : index
      %13 = vector.load %arg7[%c0_11, %c0_12] : memref<256x128xf32, #tpu.memory_space<vmem>>, vector<256x128xf32>
      tpu.vector_store %arg7[%c0_11, %c0_12], %12 {strides = array<i32>} : memref<256x128xf32, #tpu.memory_space<vmem>>, vector<256x128xf32>,
    } else {
    }
    %c0 = arith.constant 0 : index
    %c0_1 = arith.constant 0 : index
    %3 = vector.load %arg7[%c0, %c0_1] : memref<256x128xf32, #tpu.memory_space<vmem>>, vector<256x128xf32>
    %c0_2 = arith.constant 0 : index
    %c0_3 = arith.constant 0 : index
    %4 = vector.load %arg3[%c0_2, %c0_3] : memref<256x256xbf16, #tpu.memory_space<vmem>>, vector<256x256xbf16>
    %c0_4 = arith.constant 0 : index
    %c0_5 = arith.constant 0 : index
    %5 = vector.load %arg4[%c0_4, %c0_5] : memref<256x128xbf16, #tpu.memory_space<vmem>>, vector<256x128xbf16>
    %cst = arith.constant dense<0.000000e+00> : vector<256x128xf32>
    %6 = tpu.matmul %4, %5, %cst {dimension_numbers = #tpu.dot_dimension_numbers<[1], [0], [0], [1], [0, 0, 1, 1], [], []>} : vector<256x256xbf16>, vector<256x128xbf16>, vector<256x128xf32> -> vector<256x128xf32>
    %7 = arith.addf %3, %6 : vector<256x128xf32>
    %c0_6 = arith.constant 0 : index
    %c0_7 = arith.constant 0 : index
    %8 = vector.load %arg7[%c0_6, %c0_7] : memref<256x128xf32, #tpu.memory_space<vmem>>, vector<256x128xf32>
    tpu.vector_store %arg7[%c0_6, %c0_7], %7 {strides = array<i32>} : memref<256x128xf32, #tpu.memory_space<vmem>>, vector<256x128xf32>,
    %c0_i32_8 = arith.constant 0 : i32
    %9 = arith.cmpi eq, %arg2, %c0_i32_8 : i32
    %10 = arith.extui %9 : i1 to i32
    %c0_i32_9 = arith.constant 0 : i32
    %11 = arith.cmpi ne, %10, %c0_i32_9 : i32
    scf.if %11 {
      %c0_10 = arith.constant 0 : index
      %c0_11 = arith.constant 0 : index
      %12 = vector.load %arg7[%c0_10, %c0_11] : memref<256x128xf32, #tpu.memory_space<vmem>>, vector<256x128xf32>
      %c0_12 = arith.constant 0 : index
      %c0_13 = arith.constant 0 : index
      %13 = vector.load %arg5[%c0_12, %c0_13] : memref<1x128xf32, #tpu.memory_space<vmem>>, vector<1x128xf32>
      %14 = vector.broadcast %13 : vector<1x128xf32> to vector<256x128xf32>
      %15 = arith.mulf %12, %14 : vector<256x128xf32>
      %c0_14 = arith.constant 0 : index
      %c0_15 = arith.constant 0 : index
      %16 = vector.load %arg6[%c0_14, %c0_15] : memref<1x128xf32, #tpu.memory_space<vmem>>, vector<1x128xf32>
      %17 = vector.broadcast %16 : vector<1x128xf32> to vector<256x128xf32>
      %18 = arith.addf %15, %17 : vector<256x128xf32>
      %cst_16 = arith.constant 0.000000e+00 : f32
      %19 = vector.broadcast %cst_16 : f32 to vector<256x128xf32>
      %20 = arith.maximumf %18, %19 : vector<256x128xf32>
      %c0_17 = arith.constant 0 : index
      %c0_18 = arith.constant 0 : index
      %21 = vector.load %arg7[%c0_17, %c0_18] : memref<256x128xf32, #tpu.memory_space<vmem>>, vector<256x128xf32>
      tpu.vector_store %arg7[%c0_17, %c0_18], %20 {strides = array<i32>} : memref<256x128xf32, #tpu.memory_space<vmem>>, vector<256x128xf32>,
    } else {
    }
    return
  }
  func.func @transform_0(%arg0: i32, %arg1: i32, %arg2: i32) -> (i32, i32) {
    %c0_i32 = arith.constant 0 : i32
    return %arg0, %arg2 : i32, i32
  }
  func.func @transform_1(%arg0: i32, %arg1: i32, %arg2: i32) -> (i32, i32) {
    %c0_i32 = arith.constant 0 : i32
    return %arg2, %arg1 : i32, i32
  }
  func.func @transform_2(%arg0: i32, %arg1: i32, %arg2: i32) -> (i32, i32) {
    %c0_i32 = arith.constant 0 : i32
    %c0_i32_0 = arith.constant 0 : i32
    return %c0_i32, %arg1 : i32, i32
  }
  func.func @transform_3(%arg0: i32, %arg1: i32, %arg2: i32) -> (i32, i32) {
    %c0_i32 = arith.constant 0 : i32
    %c0_i32_0 = arith.constant 0 : i32
    return %c0_i32, %arg1 : i32, i32
  }
  func.func @transform_4(%arg0: i32, %arg1: i32, %arg2: i32) -> (i32, i32) {
    %c0_i32 = arith.constant 0 : i32
    return %arg0, %arg1 : i32, i32
  }
}

</mosaic_0001>

<bundles_post_ra>
// kernel: tpu_custom_call.1
= control target key start
LH: loop header
LB: loop body
LE: loop exit
PB: predicated region body
PF: predicated region fallthrough
CT: control target
= control target key end

     0   :  { %s2080_s0 = inlined_call_operand.hbm [shape: bf16[512,256], index: 0, kind: input, shape index: {}]   ;;  %s2081_s1 = inlined_call_operand.hbm [shape: bf16[256,128], index: 1, kind: input, shape index: {}]   ;;  %s2082_s2 = inlined_call_operand.vmem [shape: f32[1,128], index: 2, kind: input, shape index: {}]   ;;  %s2083_s3 = inlined_call_operand.vmem [shape: f32[1,128], index: 3, kind: input, shape index: {}]   ;;  %s2084_s4 = inlined_call_operand.hbm [shape: f32[512,128], index: 4, kind: output, shape index: {}]  }
   0x1   :  { %2086 = sst [smem:[#allocation11_spill]] %s2081_s1 }
   0x2   :  { %9 = vsyncpa [#allocation3], 0 }
   0x3   :  { %11 = vsyncpa [#allocation3 + $0x1], 0 }
   0x4   :  { %12 = vsyncpa [#allocation6], 0 }
   0x5   :  { %13 = vsyncpa [#allocation4], 0 }
   0x6   :  { %15 = vsyncpa [#allocation4 + $0x1], 0  ;;  %s1752_s15 = smov 0   ;;  %s1754_s16 = smov 0  }
   0x7   :  { %s1756_s17 = smov 0   ;;  %s1758_s18 = smov 0  }
   0x8   :  { %s1760_s19 = smov 0   ;;  %s1762_s20 = smov 0  }
   0x9 LB: > { %s1233_s21 = sadd.s32 4294967295, %s1716_s20   ;;  %s1234_s22 = sadd.s32 4294967294, %s1716_s20   ;;  %s1716_s20 = sphi %s1762_s20, %s21_s20   ;;  %s1712_s19 = sphi %s1760_s19, %s2104_s19   ;;  %s1708_s18 = sphi %s1758_s18, %s2103_s18   ;;  %s1704_s17 = sphi %s1756_s17, %s2102_s17   ;;  %s1700_s16 = sphi %s1754_s16, %s2101_s16   ;;  %s1696_s15 = sphi %s1752_s15, %s2100_s15  }
   0xa   : > { %p62_p0 = scmp.ne.s32.totalorder %s1700_s16, %s1696_s15  ;;  %p1786_p1 = scmp.eq.s32.totalorder %s1233_s21, 0 }
   0xb   : > { %p1790_p2 = scmp.eq.s32.totalorder %s1233_s21, 1  ;;  %p174_p3 = scmp.eq.s32.totalorder %s1234_s22, 1 }
   0xc   : > { %p1796_p4 = por %p1786_p1, %p62_p0  ;;  %p1235_p5 = scmp.ge.s32.totalorder %s1716_s20, 1 }
   0xd   : > { %p1801_p6 = por %p174_p3, %p62_p0  ;;  %p181_p7 = scmp.lt.s32.totalorder %s1716_s20, 3 }
   0xe   : > { %s2089_s25 = scalar_select %p1796_p4, 1, 0 }
   0xf   : > { %s2090_s26 = scalar_select %p1801_p6, 1, 0 }
  0x10   : > { %p1806_p8 = pnand %p1235_p5, %p181_p7  ;;  %s1718_s28 = smov [#allocation5]  }
  0x11   : > { %s197_s29 = sshll.u32 %s1718_s28, 4  ;;  %s40_s5 = sadd.s32 1, %s1712_s19  ;;  %s198_s29 = int_to_ptr.vmem [resolvable:$true] %s197_s29 }
  0x12   : > { %p1442_p9 = pneg %p1806_p8  ;;  %s1589_s6 = scalar_lea.vmem %s198_s29, 2048 }
  0x13   : > { %p1590_p13 = scmp.ne.s32.totalorder %s198_s29, %s1589_s6  ;;  %p1597_p5 = scmp.lt.s32.totalorder %s198_s29, %s198_s29 }
  0x14   : > { %p1815_p11 = pnand %p1442_p9, %p1786_p1  ;;  %p1598_p7 = scmp.lt.s32.totalorder %s1589_s6, %s1589_s6 }
  0x16   : > { %p1580_p12 = pneg %p1815_p11  ;;  %p1599_p6 = por %p1598_p7, %p1597_p5 }
  0x18   : > { %p1592_p0 = pnand %p1590_p13, %p1580_p12 }
  0x1a   : > { %p1593_p3 = pneg %p1592_p0 }
  0x1c   : > { %p1600_p4 = pnand %p1599_p6, %p1593_p3 }
  0x1e   : > { %1603 = shalt.err (!%p1600_p4)
}
  0x1f   : > { %s1719_s7 = smov 64   ;;  %s1720_s8 = smov 4  }
  0x20   : > { %s2093_s1 = sld [smem:[#allocation11_spill]]  ;;  %p42_p6 = scmp.ge.s32.totalorder %s40_s5, 2 }
  0x21   : > { %s49_s11 = sadd.s32 1, %s1704_s17  ;;  %p56_p4 = scmp.ne.s32.totalorder %s1704_s17, %s1700_s16 }
  0x22   : > { %p57_p9 = scmp.eq.s32.totalorder %s1716_s20, 0  ;;  %s2106_s5 = smov (%p42_p6, %s40_s5), 0 }
  0x23   : > { %p1839_p13 = por %p1790_p2, %p56_p4  ;;  %s44_s14 = ssub.s32 %s1712_s19, %s2106_s5 }
  0x24   : > { %p1833_p12 = por %p57_p9, %p56_p4  ;;  %p1455_p0 = scmp.lt.s32.totalorder %s1716_s20, 2 }
  0x25   : > { %s223_s21 = sand.u32 1, %s1704_s17  }
  0x26   : > { %1445 = dma.hbm_to_vmem [thread:$0]  (!%p1815_p11), %s2093_s1, 2048, %s198_s29, [#allocation6], %s1719_s7, %s1719_s7, %s1720_s8  }
  0x27   : > { %p47_p11 = scmp.eq.s32.totalorder %s44_s14, 0  ;;  %s1240_s22 = sshll.u32 %s223_s21, 8 }
  0x28   : > { %s1304_s29 = sshll.u32 %s1712_s19, 12  ;;  %s227_s8 = scalar_lea.vmem [#allocation2], %s1240_s22 }
  0x29   : > { %s1848_s28 = scalar_select %p47_p11, %s1704_s17, %s49_s11  }
  0x2a   : > { %s236_s7 = scalar_lea.hbm %s2080_s0, %s1304_s29  ;;  %s237_s9 = sshll.u32 %s227_s8, 4  ;;  %s238_s9 = int_to_ptr.vmem [resolvable:$true] %s237_s9 }
  0x2b   : > { %p1856_p2 = pnand %p1455_p0, %p1833_p12  ;;  %s224_s10 = scalar_lea.sflag [#allocation3], %s223_s21 }
  0x2c   : > { %s1617_s14 = scalar_lea.vmem %s238_s9, 4096  ;;  %s1721_s11 = smov [#allocation2]  }
  0x2d   : > { %p1606_p3 = pneg %p1856_p2  ;;  %p1618_p5 = scmp.ne.s32.totalorder %s238_s9, %s1617_s14 }
  0x2e   : > { %s1622_s1 = sshll.u32 %s1721_s11, 4  ;;  %s1623_s1 = int_to_ptr.vmem [resolvable:$false] %s1622_s1 }
  0x2f   : > { %p1620_p7 = pnand %p1618_p5, %p1606_p3  ;;  %s1624_s29 = scalar_lea.vmem %s1623_s1, 8192 }
  0x30   : > { %p1625_p4 = scmp.lt.s32.totalorder %s238_s9, %s1623_s1  ;;  %p1626_p9 = scmp.lt.s32.totalorder %s1624_s29, %s1617_s14 }
  0x31   : > { %p1621_p6 = pneg %p1620_p7 }
  0x32   : > { %p1627_p11 = por %p1626_p9, %p1625_p4 }
  0x34   : > { %p1628_p10 = pnand %p1627_p11, %p1621_p6 }
  0x36   : > { %1631 = shalt.err (!%p1628_p10)
}
  0x37   : > { %s1722_s12 = smov 128   ;;  %s1723_s22 = smov 8  }
  0x38   : > { %1449 = dma.hbm_to_vmem [thread:$0]  (!%p1856_p2), %s236_s7, 4096, %s238_s9, %s224_s10, %s1722_s12, %s1722_s12, %s1723_s22  }
  0x39   : > { %249 = sbr.rel (%p1806_p8) target bundleno = 375 (0x177), region = 36  ;;  %s1867_s21 = sand.u32 (!%p1806_p8), 1, %s1700_s16  }
  0x3a   : > { %s1245_s1 = sshll.u32 (!%p1806_p8), %s1867_s21, 8  ;;  %s252_s30 = scalar_lea.sflag (!%p1806_p8), [#allocation3], %s1867_s21 }
  0x3b   : > { %s1873_s6 = scalar_lea.vmem (!%p1806_p8), [#allocation2], %s1245_s1  ;;  %p2097_p10 = scmp.ne.s32.totalorder (!%p1806_p8), %s2089_s25, 0 }
  0x3e   : > { %1683 = dma.done.wait (%p2097_p10), %s252_s30, 4096  }
  0x3f   : > { %1685 = vsyncadd (%p2097_p10), %s252_s30, 4294963200 }
  0x40   : > { %1687 = dma.done.wait (%p1786_p1), [#allocation6], 2048  }
  0x41   : > { %1689 = vsyncadd (%p1786_p1), [#allocation6], 4294965248  ;;  %v1514_v0 = vld [vmem:[#allocation5 + $0x78] sm:$0xff]   ;;  %v1516_v2 = vld [vmem:[#allocation5 + $0x70] sm:$0xff]   ;;  %s1933_s8 = scalar_lea.vmem [#allocation7], %s1245_s1  ;;  %s1305_s9 = sshll.u32 %s1708_s18, 12 }
  0x42   : > { %v1515_v1 = vld [vmem:[#allocation5 + $0x38] sm:$0xff]   ;;  %1306 = vmatprep.subr.bf16.mxu0 %v1514_v0  ;;  %1418 = vmatprep.subr.bf16.mxu1 %v1514_v0  ;;  %v1517_v3 = vld [vmem:[#allocation5 + $0x30] sm:$0xff]   ;;  %v1518_v4 = vld [vmem:[#allocation5 + $0x68] sm:$0xff]   ;;  %s1106_s24 = sshll.u32 %s1933_s8, 4  ;;  %s2028_s11 = scalar_lea.hbm %s2084_s4, %s1305_s9  ;;  %s2030_s24 = int_to_ptr.vmem [resolvable:$true] %s1106_s24 }
  0x43   : > { %1307 = vmatpush3.bf16.msra.mxu0 %v1515_v1  ;;  %1426 = vmatpush3.bf16.msra.mxu1 %v1515_v1  ;;  %v1519_v5 = vld [vmem:[#allocation5 + $0x28] sm:$0xff]   ;;  %v1520_v6 = vld [vmem:[#allocation5 + $0x60] sm:$0xff]   ;;  %v1522_v8 = vld [vmem:[#allocation5 + $0x58] sm:$0xff]   ;;  %s1092_s18 = scalar_lea.sflag [#allocation4], %s1867_s21  ;;  %s1632_s29 = scalar_lea.vmem %s2030_s24, 4096 }
  0x44   : > { %1308 = vmatprep.subr.bf16.mxu0 %v1516_v2  ;;  %1419 = vmatprep.subr.bf16.mxu1 %v1516_v2  ;;  %v1521_v7 = vld [vmem:[#allocation5 + $0x20] sm:$0xff]   ;;  %v1523_v9 = vld [vmem:[#allocation5 + $0x18] sm:$0xff]   ;;  %v1524_v10 = vld [vmem:[#allocation5 + $0x50] sm:$0xff]   ;;  %p1633_p1 = scmp.ne.s32.totalorder %s2030_s24, %s1632_s29  ;;  %s1724_s12 = smov [#allocation7]  }
  0x45   : > { %v1532_v11 = vld [vmem:[%s1873_s6 + $0x4] ss:$8 sps:$4 sm:$0xff]   ;;  %v1525_v13 = vld [vmem:[#allocation5 + $0x10] sm:$0xff]   ;;  %v1530_v18 = vld [vmem:[%s1873_s6] ss:$8 sps:$4 sm:$0xff]   ;;  %s1636_s22 = sshll.u32 %s1724_s12, 4  ;;  %s1637_s22 = int_to_ptr.vmem [resolvable:$false] %s1636_s22 }
  0x46   : > { %v1535_v12 = vld [vmem:[%s1873_s6 + $0x84] ss:$8 sps:$4 sm:$0xff]   ;;  %721 = vmatprep.mubr.bf16.mxu0 %v1532_v11  ;;  %v1533_v19 = vld [vmem:[%s1873_s6 + $0x80] ss:$8 sps:$4 sm:$0xff]   ;;  %v1536_v20 = vld [vmem:[%s1873_s6 + $0x14] ss:$8 sps:$4 sm:$0xff]   ;;  %p1634_p8 = pnand %p1633_p1, %p1839_p13  ;;  %p1639_p0 = scmp.lt.s32.totalorder %s2030_s24, %s1637_s22 }
  0x47   : > { %1309 = vmatpush3.bf16.msra.mxu0 %v1517_v3  ;;  %1427 = vmatpush3.bf16.msra.mxu1 %v1517_v3  ;;  %v1526_v14 = vld [vmem:[#allocation5 + $0x48] sm:$0xff]   ;;  %v1528_v16 = vld [vmem:[#allocation5 + $0x40] sm:$0xff]   ;;  %v1538_v21 = vld [vmem:[%s1873_s6 + $0x94] ss:$8 sps:$4 sm:$0xff]   ;;  %s1638_s1 = scalar_lea.vmem %s1637_s22, 8192 }
  0x48   : > { %1310 = vmatprep.subr.bf16.mxu0 %v1518_v4  ;;  %1420 = vmatprep.subr.bf16.mxu1 %v1518_v4  ;;  %v1527_v15 = vld [vmem:[#allocation5 + $0x8] sm:$0xff]   ;;  %v1529_v17 = vld [vmem:[#allocation5] sm:$0xff]   ;;  %v1540_v22 = vld [vmem:[%s1873_s6 + $0x10] ss:$8 sps:$4 sm:$0xff]   ;;  %p1635_p12 = pneg %p1634_p8  ;;  %p1640_p2 = scmp.lt.s32.totalorder %s1638_s1, %s1632_s29 }
  0x49   : > { %785 = vmatprep.mubr.bf16.mxu1 %v1535_v12  ;;  %v1541_v23 = vld [vmem:[%s1873_s6 + $0x90] ss:$8 sps:$4 sm:$0xff]   ;;  %v1542_v24 = vld [vmem:[%s1873_s6 + $0x24] ss:$8 sps:$4 sm:$0xff]   ;;  %v1546_v26 = vld [vmem:[%s1873_s6 + $0x20] ss:$8 sps:$4 sm:$0xff]  }
  0x4a   : > { %v1544_v25 = vld [vmem:[%s1873_s6 + $0xa4] ss:$8 sps:$4 sm:$0xff]   ;;  %v1547_v27 = vld [vmem:[%s1873_s6 + $0xa0] ss:$8 sps:$4 sm:$0xff]   ;;  %v1548_v28 = vld [vmem:[%s1873_s6 + $0x34] ss:$8 sps:$4 sm:$0xff]   ;;  %p1641_p3 = por %p1640_p2, %p1639_p0 }
  0x4b   : > { %1311 = vmatpush3.bf16.msra.mxu0 %v1519_v5  ;;  %1428 = vmatpush3.bf16.msra.mxu1 %v1519_v5  ;;  %v1550_v29 = vld [vmem:[%s1873_s6 + $0xb4] ss:$8 sps:$4 sm:$0xff]   ;;  %v1552_v30 = vld [vmem:[%s1873_s6 + $0x30] ss:$8 sps:$4 sm:$0xff]   ;;  %v1554_v32 = vld [vmem:[%s1873_s6 + $0x44] ss:$8 sps:$4 sm:$0xff]  }
  0x4c   : > { %1312 = vmatprep.subr.bf16.mxu0 %v1520_v6  ;;  %1421 = vmatprep.subr.bf16.mxu1 %v1520_v6  ;;  %v1553_v31 = vld [vmem:[%s1873_s6 + $0xb0] ss:$8 sps:$4 sm:$0xff]   ;;  %v1556_v33 = vld [vmem:[%s1873_s6 + $0xc4] ss:$8 sps:$4 sm:$0xff]   ;;  %v1558_v34 = vld [vmem:[%s1873_s6 + $0x40] ss:$8 sps:$4 sm:$0xff]   ;;  %p1642_p5 = pnand %p1641_p3, %p1635_p12 }
  0x4d   : > { %v1559_v35 = vld [vmem:[%s1873_s6 + $0xc0] ss:$8 sps:$4 sm:$0xff]   ;;  %v1560_v36 = vld [vmem:[%s1873_s6 + $0x54] ss:$8 sps:$4 sm:$0xff]   ;;  %v1564_v38 = vld [vmem:[%s1873_s6 + $0x50] ss:$8 sps:$4 sm:$0xff]  }
  0x4e   : > { %v1562_v37 = vld [vmem:[%s1873_s6 + $0xd4] ss:$8 sps:$4 sm:$0xff]   ;;  %v1565_v39 = vld [vmem:[%s1873_s6 + $0xd0] ss:$8 sps:$4 sm:$0xff]   ;;  %v1566_v40 = vld [vmem:[%s1873_s6 + $0x64] ss:$8 sps:$4 sm:$0xff]  }
  0x4f   : > { %1313 = vmatpush3.bf16.msra.mxu0 %v1521_v7  ;;  %1429 = vmatpush3.bf16.msra.mxu1 %v1521_v7  ;;  %v1568_v41 = vld [vmem:[%s1873_s6 + $0xe4] ss:$8 sps:$4 sm:$0xff]   ;;  %v1570_v42 = vld [vmem:[%s1873_s6 + $0x60] ss:$8 sps:$4 sm:$0xff]   ;;  %v1572_v44 = vld [vmem:[%s1873_s6 + $0x74] ss:$8 sps:$4 sm:$0xff]  }
  0x50   : > { %1314 = vmatprep.subr.bf16.mxu0 %v1522_v8  ;;  %1422 = vmatprep.subr.bf16.mxu1 %v1522_v8  ;;  %v1571_v43 = vld [vmem:[%s1873_s6 + $0xe0] ss:$8 sps:$4 sm:$0xff]   ;;  %v1574_v45 = vld [vmem:[%s1873_s6 + $0xf4] ss:$8 sps:$4 sm:$0xff]   ;;  %v1576_v46 = vld [vmem:[%s1873_s6 + $0x70] ss:$8 sps:$4 sm:$0xff]  }
  0x51   : > { %v1577_v47 = vld [vmem:[%s1873_s6 + $0xf0] ss:$8 sps:$4 sm:$0xff]   ;;  %v1918_v54 = vld [vmem:[%s2082_s2] ss:$0 sm:$0xff] }
  0x52   : > { %v1923_v57 = vld [vmem:[%s2083_s3] ss:$0 sm:$0xff] }
  0x53   : > { %1315 = vmatpush3.bf16.msra.mxu0 %v1523_v9  ;;  %1430 = vmatpush3.bf16.msra.mxu1 %v1523_v9 }
  0x54   : > { %1316 = vmatprep.subr.bf16.mxu0 %v1524_v10  ;;  %1423 = vmatprep.subr.bf16.mxu1 %v1524_v10 }
  0x57   : > { %1317 = vmatpush3.bf16.msra.mxu0 %v1525_v13  ;;  %1431 = vmatpush3.bf16.msra.mxu1 %v1525_v13 }
  0x58   : > { %1318 = vmatprep.subr.bf16.mxu0 %v1526_v14  ;;  %1424 = vmatprep.subr.bf16.mxu1 %v1526_v14 }
  0x5b   : > { %1319 = vmatpush3.bf16.msra.mxu0 %v1527_v15  ;;  %1432 = vmatpush3.bf16.msra.mxu1 %v1527_v15 }
  0x5c   : > { %1320 = vmatprep.subr.bf16.mxu0 %v1528_v16  ;;  %1425 = vmatprep.subr.bf16.mxu1 %v1528_v16 }
  0x5f   : > { %1321 = vmatpush3.bf16.msra.mxu0 %v1529_v17  ;;  %1433 = vmatpush3.bf16.msra.mxu1 %v1529_v17 }
  0x62   : > { %722 = vmatmul.mubr.bf16.vlgmr.msra.gmra.mxu0 %v1530_v18  ;;  %786 = vmatmul.mubr.bf16.vlgmr.msra.gmra.mxu1 %v1533_v19 }
  0x63   : > { %729 = vmatprep.mubr.bf16.mxu0 %v1536_v20  ;;  %793 = vmatprep.mubr.bf16.mxu1 %v1538_v21 }
  0x6a   : > { %730 = vmatmul.mubr.bf16.gmra.mxu0 %v1540_v22  ;;  %794 = vmatmul.mubr.bf16.gmra.mxu1 %v1541_v23 }
  0x6b   : > { %737 = vmatprep.mubr.bf16.mxu0 %v1542_v24  ;;  %801 = vmatprep.mubr.bf16.mxu1 %v1544_v25 }
  0x72   : > { %738 = vmatmul.mubr.bf16.gmra.mxu0 %v1546_v26  ;;  %802 = vmatmul.mubr.bf16.gmra.mxu1 %v1547_v27 }
  0x73   : > { %745 = vmatprep.mubr.bf16.mxu0 %v1548_v28  ;;  %809 = vmatprep.mubr.bf16.mxu1 %v1550_v29 }
  0x7a   : > { %746 = vmatmul.mubr.bf16.gmra.mxu0 %v1552_v30  ;;  %810 = vmatmul.mubr.bf16.gmra.mxu1 %v1553_v31 }
  0x7b   : > { %753 = vmatprep.mubr.bf16.mxu0 %v1554_v32  ;;  %817 = vmatprep.mubr.bf16.mxu1 %v1556_v33 }
  0x82   : > { %754 = vmatmul.mubr.bf16.gmra.mxu0 %v1558_v34  ;;  %818 = vmatmul.mubr.bf16.gmra.mxu1 %v1559_v35 }
  0x83   : > { %761 = vmatprep.mubr.bf16.mxu0 %v1560_v36  ;;  %825 = vmatprep.mubr.bf16.mxu1 %v1562_v37 }
  0x8a   : > { %762 = vmatmul.mubr.bf16.gmra.mxu0 %v1564_v38  ;;  %826 = vmatmul.mubr.bf16.gmra.mxu1 %v1565_v39 }
  0x8b   : > { %769 = vmatprep.mubr.bf16.mxu0 %v1566_v40  ;;  %833 = vmatprep.mubr.bf16.mxu1 %v1568_v41 }
  0x92   : > { %770 = vmatmul.mubr.bf16.gmra.mxu0 %v1570_v42  ;;  %834 = vmatmul.mubr.bf16.gmra.mxu1 %v1571_v43 }
  0x93   : > { %777 = vmatprep.mubr.bf16.mxu0 %v1572_v44  ;;  %841 = vmatprep.mubr.bf16.mxu1 %v1574_v45 }
  0x9a   : > { %778 = vmatmul.mubr.bf16.gmra.mxu0 %v1576_v46  ;;  %842 = vmatmul.mubr.bf16.gmra.mxu1 %v1577_v47 }
 0x122   : > { %v1322_v48 = vpop.f32.mrf.mxu0  ;;  %v1370_v49 = vpop.f32.mrf.mxu1 }
 0x124   : > { %v1323_v50 = vpop.f32.mrf.mxu0  ;;  %v1371_v51 = vpop.f32.mrf.mxu1 }
 0x125   : > { %v1324_v52 = vadd.f32 %v1323_v50, %v1322_v48  ;;  %v1372_v53 = vadd.f32 %v1371_v51, %v1370_v49 }
 0x126   : > { %v1325_v55 = vpop.f32.mrf.mxu0  ;;  %v1373_v56 = vpop.f32.mrf.mxu1 }
 0x127   : > { %v956_v60 = vmul.f32 %v1324_v52, %v1918_v54  ;;  %v972_v61 = vmul.f32 %v1372_v53, %v1918_v54 }
 0x128   : > { %v1326_v58 = vpop.f32.mrf.mxu0  ;;  %v1374_v59 = vpop.f32.mrf.mxu1 }
 0x129   : > { %v1327_v62 = vadd.f32 %v1326_v58, %v1325_v55  ;;  %v1375_v63 = vadd.f32 %v1374_v59, %v1373_v56  ;;  %v995_v2 = vadd.f32 %v1923_v57, %v956_v60  ;;  %v1011_v3 = vadd.f32 %v1923_v57, %v972_v61 }
 0x12a   : > { %v1328_v0 = vpop.f32.mrf.mxu0  ;;  %v1376_v1 = vpop.f32.mrf.mxu1 }
 0x12b   : > { %v1027_v6 = vmax.f32 %v995_v2, 0.0  ;;  %v1043_v7 = vmax.f32 %v1011_v3, 0.0  ;;  %v957_v8 = vmul.f32 %v1327_v62, %v1918_v54  ;;  %v973_v9 = vmul.f32 %v1375_v63, %v1918_v54 }
 0x12c   : > { %v1329_v4 = vpop.f32.mrf.mxu0  ;;  %v1377_v5 = vpop.f32.mrf.mxu1 }
 0x12d   : > { %v1330_v10 = vadd.f32 %v1329_v4, %v1328_v0  ;;  %v1378_v11 = vadd.f32 %v1377_v5, %v1376_v1  ;;  %1059 = vst [vmem:[%s1933_s8] sm:$0xff] %v1027_v6  ;;  %1075 = vst [vmem:[%s1933_s8 + $0x80] sm:$0xff] %v1043_v7  ;;  %v996_v14 = vadd.f32 %v1923_v57, %v957_v8 }
 0x12e   : > { %v1331_v12 = vpop.f32.mrf.mxu0  ;;  %v1379_v13 = vpop.f32.mrf.mxu1  ;;  %v1012_v15 = vadd.f32 %v1923_v57, %v973_v9 }
 0x12f   : > { %v1028_v18 = vmax.f32 %v996_v14, 0.0  ;;  %v958_v22 = vmul.f32 %v1330_v10, %v1918_v54  ;;  %v974_v23 = vmul.f32 %v1378_v11, %v1918_v54 }
 0x130   : > { %v1332_v16 = vpop.f32.mrf.mxu0  ;;  %v1380_v17 = vpop.f32.mrf.mxu1  ;;  %v1044_v19 = vmax.f32 %v1012_v15, 0.0 }
 0x131   : > { %v1333_v20 = vadd.f32 %v1332_v16, %v1331_v12  ;;  %v1381_v21 = vadd.f32 %v1380_v17, %v1379_v13  ;;  %1060 = vst [vmem:[%s1933_s8 + $0x8] sm:$0xff] %v1028_v18  ;;  %v997_v26 = vadd.f32 %v1923_v57, %v958_v22  ;;  %v1013_v27 = vadd.f32 %v1923_v57, %v974_v23 }
 0x132   : > { %v1334_v24 = vpop.f32.mrf.mxu0  ;;  %v1382_v25 = vpop.f32.mrf.mxu1  ;;  %1076 = vst [vmem:[%s1933_s8 + $0x88] sm:$0xff] %v1044_v19 }
 0x133   : > { %v959_v30 = vmul.f32 %v1333_v20, %v1918_v54  ;;  %v975_v31 = vmul.f32 %v1381_v21, %v1918_v54  ;;  %v1029_v34 = vmax.f32 %v997_v26, 0.0  ;;  %v1045_v35 = vmax.f32 %v1013_v27, 0.0 }
 0x134   : > { %v1335_v28 = vpop.f32.mrf.mxu0  ;;  %v1383_v29 = vpop.f32.mrf.mxu1 }
 0x135   : > { %v1336_v32 = vadd.f32 %v1335_v28, %v1334_v24  ;;  %v1384_v33 = vadd.f32 %v1383_v29, %v1382_v25  ;;  %v998_v38 = vadd.f32 %v1923_v57, %v959_v30  ;;  %v1014_v39 = vadd.f32 %v1923_v57, %v975_v31  ;;  %1061 = vst [vmem:[%s1933_s8 + $0x10] sm:$0xff] %v1029_v34 }
 0x136   : > { %v1337_v36 = vpop.f32.mrf.mxu0  ;;  %v1385_v37 = vpop.f32.mrf.mxu1  ;;  %1077 = vst [vmem:[%s1933_s8 + $0x90] sm:$0xff] %v1045_v35 }
 0x137   : > { %v1030_v42 = vmax.f32 %v998_v38, 0.0  ;;  %v1046_v43 = vmax.f32 %v1014_v39, 0.0  ;;  %v960_v44 = vmul.f32 %v1336_v32, %v1918_v54  ;;  %v976_v45 = vmul.f32 %v1384_v33, %v1918_v54 }
 0x138   : > { %v1338_v40 = vpop.f32.mrf.mxu0  ;;  %v1386_v41 = vpop.f32.mrf.mxu1 }
 0x139   : > { %v1339_v46 = vadd.f32 %v1338_v40, %v1337_v36  ;;  %v1387_v47 = vadd.f32 %v1386_v41, %v1385_v37  ;;  %1062 = vst [vmem:[%s1933_s8 + $0x18] sm:$0xff] %v1030_v42  ;;  %1078 = vst [vmem:[%s1933_s8 + $0x98] sm:$0xff] %v1046_v43  ;;  %v999_v50 = vadd.f32 %v1923_v57, %v960_v44 }
 0x13a   : > { %v1340_v48 = vpop.f32.mrf.mxu0  ;;  %v1388_v49 = vpop.f32.mrf.mxu1  ;;  %v1015_v51 = vadd.f32 %v1923_v57, %v976_v45 }
 0x13b   : > { %v1031_v55 = vmax.f32 %v999_v50, 0.0  ;;  %v961_v60 = vmul.f32 %v1339_v46, %v1918_v54  ;;  %v977_v61 = vmul.f32 %v1387_v47, %v1918_v54 }
 0x13c   : > { %v1341_v52 = vpop.f32.mrf.mxu0  ;;  %v1389_v53 = vpop.f32.mrf.mxu1  ;;  %v1047_v56 = vmax.f32 %v1015_v51, 0.0 }
 0x13d   : > { %v1342_v58 = vadd.f32 %v1341_v52, %v1340_v48  ;;  %v1390_v59 = vadd.f32 %v1389_v53, %v1388_v49  ;;  %1063 = vst [vmem:[%s1933_s8 + $0x20] sm:$0xff] %v1031_v55  ;;  %v1000_v0 = vadd.f32 %v1923_v57, %v961_v60  ;;  %v1016_v1 = vadd.f32 %v1923_v57, %v977_v61 }
 0x13e   : > { %v1343_v62 = vpop.f32.mrf.mxu0  ;;  %v1391_v63 = vpop.f32.mrf.mxu1  ;;  %1079 = vst [vmem:[%s1933_s8 + $0xa0] sm:$0xff] %v1047_v56 }
 0x13f   : > { %v962_v4 = vmul.f32 %v1342_v58, %v1918_v54  ;;  %v978_v5 = vmul.f32 %v1390_v59, %v1918_v54  ;;  %v1032_v8 = vmax.f32 %v1000_v0, 0.0  ;;  %v1048_v9 = vmax.f32 %v1016_v1, 0.0 }
 0x140   : > { %v1344_v2 = vpop.f32.mrf.mxu0  ;;  %v1392_v3 = vpop.f32.mrf.mxu1 }
 0x141   : > { %v1345_v6 = vadd.f32 %v1344_v2, %v1343_v62  ;;  %v1393_v7 = vadd.f32 %v1392_v3, %v1391_v63  ;;  %v1001_v12 = vadd.f32 %v1923_v57, %v962_v4  ;;  %v1017_v13 = vadd.f32 %v1923_v57, %v978_v5  ;;  %1064 = vst [vmem:[%s1933_s8 + $0x28] sm:$0xff] %v1032_v8 }
 0x142   : > { %v1346_v10 = vpop.f32.mrf.mxu0  ;;  %v1394_v11 = vpop.f32.mrf.mxu1  ;;  %1080 = vst [vmem:[%s1933_s8 + $0xa8] sm:$0xff] %v1048_v9 }
 0x143   : > { %v1033_v16 = vmax.f32 %v1001_v12, 0.0  ;;  %v1049_v17 = vmax.f32 %v1017_v13, 0.0  ;;  %v963_v18 = vmul.f32 %v1345_v6, %v1918_v54  ;;  %v979_v19 = vmul.f32 %v1393_v7, %v1918_v54 }
 0x144   : > { %v1347_v14 = vpop.f32.mrf.mxu0  ;;  %v1395_v15 = vpop.f32.mrf.mxu1 }
 0x145   : > { %v1348_v20 = vadd.f32 %v1347_v14, %v1346_v10  ;;  %v1396_v21 = vadd.f32 %v1395_v15, %v1394_v11  ;;  %1065 = vst [vmem:[%s1933_s8 + $0x30] sm:$0xff] %v1033_v16  ;;  %1081 = vst [vmem:[%s1933_s8 + $0xb0] sm:$0xff] %v1049_v17  ;;  %v1002_v24 = vadd.f32 %v1923_v57, %v963_v18 }
 0x146   : > { %v1349_v22 = vpop.f32.mrf.mxu0  ;;  %v1397_v23 = vpop.f32.mrf.mxu1  ;;  %v1018_v25 = vadd.f32 %v1923_v57, %v979_v19 }
 0x147   : > { %v1034_v28 = vmax.f32 %v1002_v24, 0.0  ;;  %v964_v32 = vmul.f32 %v1348_v20, %v1918_v54  ;;  %v980_v33 = vmul.f32 %v1396_v21, %v1918_v54 }
 0x148   : > { %v1350_v26 = vpop.f32.mrf.mxu0  ;;  %v1398_v27 = vpop.f32.mrf.mxu1  ;;  %v1050_v29 = vmax.f32 %v1018_v25, 0.0 }
 0x149   : > { %v1351_v30 = vadd.f32 %v1350_v26, %v1349_v22  ;;  %v1399_v31 = vadd.f32 %v1398_v27, %v1397_v23  ;;  %1066 = vst [vmem:[%s1933_s8 + $0x38] sm:$0xff] %v1034_v28  ;;  %v1003_v36 = vadd.f32 %v1923_v57, %v964_v32  ;;  %v1019_v37 = vadd.f32 %v1923_v57, %v980_v33 }
 0x14a   : > { %v1352_v34 = vpop.f32.mrf.mxu0  ;;  %v1400_v35 = vpop.f32.mrf.mxu1  ;;  %1082 = vst [vmem:[%s1933_s8 + $0xb8] sm:$0xff] %v1050_v29 }
 0x14b   : > { %v965_v40 = vmul.f32 %v1351_v30, %v1918_v54  ;;  %v981_v41 = vmul.f32 %v1399_v31, %v1918_v54  ;;  %v1035_v44 = vmax.f32 %v1003_v36, 0.0  ;;  %v1051_v45 = vmax.f32 %v1019_v37, 0.0 }
 0x14c   : > { %v1353_v38 = vpop.f32.mrf.mxu0  ;;  %v1401_v39 = vpop.f32.mrf.mxu1 }
 0x14d   : > { %v1354_v42 = vadd.f32 %v1353_v38, %v1352_v34  ;;  %v1402_v43 = vadd.f32 %v1401_v39, %v1400_v35  ;;  %v1004_v48 = vadd.f32 %v1923_v57, %v965_v40  ;;  %v1020_v49 = vadd.f32 %v1923_v57, %v981_v41  ;;  %1067 = vst [vmem:[%s1933_s8 + $0x40] sm:$0xff] %v1035_v44 }
 0x14e   : > { %v1355_v46 = vpop.f32.mrf.mxu0  ;;  %v1403_v47 = vpop.f32.mrf.mxu1  ;;  %1083 = vst [vmem:[%s1933_s8 + $0xc0] sm:$0xff] %v1051_v45 }
 0x14f   : > { %v1036_v52 = vmax.f32 %v1004_v48, 0.0  ;;  %v1052_v53 = vmax.f32 %v1020_v49, 0.0  ;;  %v966_v55 = vmul.f32 %v1354_v42, %v1918_v54  ;;  %v982_v56 = vmul.f32 %v1402_v43, %v1918_v54 }
 0x150   : > { %v1356_v50 = vpop.f32.mrf.mxu0  ;;  %v1404_v51 = vpop.f32.mrf.mxu1 }
 0x151   : > { %v1357_v58 = vadd.f32 %v1356_v50, %v1355_v46  ;;  %v1405_v59 = vadd.f32 %v1404_v51, %v1403_v47  ;;  %1068 = vst [vmem:[%s1933_s8 + $0x48] sm:$0xff] %v1036_v52  ;;  %1084 = vst [vmem:[%s1933_s8 + $0xc8] sm:$0xff] %v1052_v53  ;;  %v1005_v62 = vadd.f32 %v1923_v57, %v966_v55 }
 0x152   : > { %v1358_v60 = vpop.f32.mrf.mxu0  ;;  %v1406_v61 = vpop.f32.mrf.mxu1  ;;  %v1021_v63 = vadd.f32 %v1923_v57, %v982_v56 }
 0x153   : > { %v1037_v2 = vmax.f32 %v1005_v62, 0.0  ;;  %v967_v6 = vmul.f32 %v1357_v58, %v1918_v54  ;;  %v983_v7 = vmul.f32 %v1405_v59, %v1918_v54 }
 0x154   : > { %v1359_v0 = vpop.f32.mrf.mxu0  ;;  %v1407_v1 = vpop.f32.mrf.mxu1  ;;  %v1053_v3 = vmax.f32 %v1021_v63, 0.0 }
 0x155   : > { %v1360_v4 = vadd.f32 %v1359_v0, %v1358_v60  ;;  %v1408_v5 = vadd.f32 %v1407_v1, %v1406_v61  ;;  %1069 = vst [vmem:[%s1933_s8 + $0x50] sm:$0xff] %v1037_v2  ;;  %v1006_v10 = vadd.f32 %v1923_v57, %v967_v6  ;;  %v1022_v11 = vadd.f32 %v1923_v57, %v983_v7 }
 0x156   : > { %v1361_v8 = vpop.f32.mrf.mxu0  ;;  %v1409_v9 = vpop.f32.mrf.mxu1  ;;  %1085 = vst [vmem:[%s1933_s8 + $0xd0] sm:$0xff] %v1053_v3 }
 0x157   : > { %v968_v14 = vmul.f32 %v1360_v4, %v1918_v54  ;;  %v984_v15 = vmul.f32 %v1408_v5, %v1918_v54  ;;  %v1038_v18 = vmax.f32 %v1006_v10, 0.0  ;;  %v1054_v19 = vmax.f32 %v1022_v11, 0.0 }
 0x158   : > { %v1362_v12 = vpop.f32.mrf.mxu0  ;;  %v1410_v13 = vpop.f32.mrf.mxu1 }
 0x159   : > { %v1363_v16 = vadd.f32 %v1362_v12, %v1361_v8  ;;  %v1411_v17 = vadd.f32 %v1410_v13, %v1409_v9  ;;  %v1007_v22 = vadd.f32 %v1923_v57, %v968_v14  ;;  %v1023_v23 = vadd.f32 %v1923_v57, %v984_v15  ;;  %1070 = vst [vmem:[%s1933_s8 + $0x58] sm:$0xff] %v1038_v18 }
 0x15a   : > { %v1364_v20 = vpop.f32.mrf.mxu0  ;;  %v1412_v21 = vpop.f32.mrf.mxu1  ;;  %1086 = vst [vmem:[%s1933_s8 + $0xd8] sm:$0xff] %v1054_v19 }
 0x15b   : > { %v1039_v26 = vmax.f32 %v1007_v22, 0.0  ;;  %v1055_v27 = vmax.f32 %v1023_v23, 0.0  ;;  %v969_v28 = vmul.f32 %v1363_v16, %v1918_v54  ;;  %v985_v29 = vmul.f32 %v1411_v17, %v1918_v54 }
 0x15c   : > { %v1365_v24 = vpop.f32.mrf.mxu0  ;;  %v1413_v25 = vpop.f32.mrf.mxu1 }
 0x15d   : > { %v1366_v30 = vadd.f32 %v1365_v24, %v1364_v20  ;;  %v1414_v31 = vadd.f32 %v1413_v25, %v1412_v21  ;;  %1071 = vst [vmem:[%s1933_s8 + $0x60] sm:$0xff] %v1039_v26  ;;  %1087 = vst [vmem:[%s1933_s8 + $0xe0] sm:$0xff] %v1055_v27  ;;  %v1008_v34 = vadd.f32 %v1923_v57, %v969_v28 }
 0x15e   : > { %v1367_v32 = vpop.f32.mrf.mxu0  ;;  %v1415_v33 = vpop.f32.mrf.mxu1  ;;  %v1024_v35 = vadd.f32 %v1923_v57, %v985_v29 }
 0x15f   : > { %v1040_v38 = vmax.f32 %v1008_v34, 0.0  ;;  %v970_v42 = vmul.f32 %v1366_v30, %v1918_v54  ;;  %v986_v43 = vmul.f32 %v1414_v31, %v1918_v54 }
 0x160   : > { %v1368_v36 = vpop.f32.mrf.mxu0  ;;  %v1416_v37 = vpop.f32.mrf.mxu1  ;;  %v1056_v39 = vmax.f32 %v1024_v35, 0.0 }
 0x161   : > { %v1369_v40 = vadd.f32 %v1368_v36, %v1367_v32  ;;  %v1417_v41 = vadd.f32 %v1416_v37, %v1415_v33  ;;  %1072 = vst [vmem:[%s1933_s8 + $0x68] sm:$0xff] %v1040_v38  ;;  %v1009_v44 = vadd.f32 %v1923_v57, %v970_v42  ;;  %v1025_v45 = vadd.f32 %v1923_v57, %v986_v43 }
 0x162   : > { %1088 = vst [vmem:[%s1933_s8 + $0xe8] sm:$0xff] %v1056_v39 }
 0x163   : > { %v971_v46 = vmul.f32 %v1369_v40, %v1918_v54  ;;  %v987_v47 = vmul.f32 %v1417_v41, %v1918_v54  ;;  %v1041_v48 = vmax.f32 %v1009_v44, 0.0  ;;  %v1057_v49 = vmax.f32 %v1025_v45, 0.0 }
 0x165   : > { %v1010_v50 = vadd.f32 %v1923_v57, %v971_v46  ;;  %v1026_v51 = vadd.f32 %v1923_v57, %v987_v47  ;;  %1073 = vst [vmem:[%s1933_s8 + $0x70] sm:$0xff] %v1041_v48  ;;  %1089 = vst [vmem:[%s1933_s8 + $0xf0] sm:$0xff] %v1057_v49 }
 0x167   : > { %v1042_v54 = vmax.f32 %v1010_v50, 0.0  ;;  %v1058_v52 = vmax.f32 %v1026_v51, 0.0 }
 0x169   : > { %1074 = vst [vmem:[%s1933_s8 + $0x78] sm:$0xff] %v1042_v54  ;;  %1090 = vst [vmem:[%s1933_s8 + $0xf8] sm:$0xff] %v1058_v52 }
 0x16a   : > { %1645 = shalt.err (!%p1642_p5)
}
 0x16b   : > { %s1646_s30 = scalar_lea.hbm %s2028_s11, 4096  ;;  %s1650_s25 = scalar_lea.hbm %s2084_s4, 8192 }
 0x16c   : > { %p1647_p7 = scmp.ne.s32.totalorder %s2028_s11, %s1646_s30  ;;  %p1651_p9 = scmp.lt.s32.totalorder %s2028_s11, %s2084_s4 }
 0x16d   : > { %p1652_p11 = scmp.lt.s32.totalorder %s1650_s25, %s1646_s30 }
 0x16e   : > { %p1648_p6 = pnand %p1647_p7, %p1839_p13 }
 0x16f   : > { %p1653_p10 = por %p1652_p11, %p1651_p9 }
 0x170   : > { %p1649_p4 = pneg %p1648_p6 }
 0x172   : > { %p1654_p1 = pnand %p1653_p10, %p1649_p4 }
 0x174   : > { %1657 = shalt.err (!%p1654_p1)
}
 0x175   : > { %s1725_s8 = smov 128   ;;  %s1726_s9 = smov 8  }
 0x176   : > { %1440 = dma.vmem_to_hbm [thread:$0]  (%p1839_p13), %s2030_s24, 4096, %s2028_s11, %s1092_s18, %s1725_s8, %s1725_s8, %s1726_s9  }
 0x177 PF: > { %s1121_s10 = sand.u32 1, %s1696_s15   ;;  %p2098_p8 = scmp.ne.s32.totalorder %s2090_s26, 0 }
 0x178   : > { %p2099_p12 = scmp.ge.s32.totalorder %s1716_s20, 2  ;;  %s1122_s14 = scalar_lea.sflag [#allocation4], %s1121_s10 }
 0x17a   : > { %p1451_p0 = pnand %p2099_p12, %p2098_p8 }
 0x17c   : > { %p1452_p2 = pneg %p1451_p0 }
 0x17e   : > { %1691 = dma.done.wait (%p1452_p2), %s1122_s14, 4096  }
 0x17f   : > { %1693 = vsyncadd (%p1452_p2), %s1122_s14, 4294963200  ;;  %s21_s20 = sadd.s32 1, %s1716_s20   ;;  %s2100_s15 = smov %s1700_s16 }
 0x180   : > { %p18_p3 = scmp.ge.s32.totalorder %s21_s20, 4   ;;  %s2101_s16 = smov %s1704_s17 }
 0x181   : > { %s2102_s17 = smov %s1848_s28  ;;  %s2103_s18 = smov %s1712_s19 }
 0x182   : > { %s2104_s19 = smov %s2106_s5  ;;  %20 = sbr.rel (!%p18_p3) target bundleno = 9 (0x9), region = 100 }
 0x187   :  { %1127 = vsyncpa [#allocation3], 1 }
 0x188   :  { %1129 = vsyncpa [#allocation3 + $0x1], 1 }
 0x189   :  { %1130 = vsyncpa [#allocation6], 1 }
 0x18a   :  { %1131 = vsyncpa [#allocation4], 1 }
 0x18b   :  { %1133 = vsyncpa [#allocation4 + $0x1], 1 }

</bundles_post_ra>
